<compile_context>
chip_gen: v6e
topology: v6e:2x2x1
jax: 0.10.0
libtpu: 0.0.40
codegen_flags: <defaults>
</compile_context>

<pallas_src>
import jax
import jax.numpy as jnp
from jax.experimental import pallas as pl
from jax.experimental.pallas import tpu as pltpu

_MIB = 1024 * 1024


def lr_mlp_kernel(x_ref, w1_ref, b1_ref, w2_ref, b2_ref, w3_ref, b3_ref, o_ref):
    """One batch tile: [TILE_B, D] -> [TILE_B, 1] logits column."""
    # In-kernel cast to the compute dtype (avoids a separate XLA pass over x).
    x = x_ref[...].astype(w1_ref.dtype)
    # fc_1 + ReLU (MXU, f32 accumulation)
    h1 = jnp.dot(x, w1_ref[...], preferred_element_type=jnp.float32)
    h1 = jnp.maximum(h1 + b1_ref[...], 0.0)
    # dropout (p=0.1) in eval mode is identity.
    # fc_2 + ReLU
    h2 = jnp.dot(h1.astype(w2_ref.dtype), w2_ref[...],
                 preferred_element_type=jnp.float32)
    h2 = jnp.maximum(h2 + b2_ref[...], 0.0)
    # fc_3: w3 stored as a [d2, 1] column -> natural MXU orientation, no
    # transpose of h2; the [TILE_B, 1] store is tiny.
    out = jnp.dot(h2.astype(w3_ref.dtype), w3_ref[...],
                  preferred_element_type=jnp.float32)          # [TILE_B, 1]
    o_ref[...] = (out + b3_ref[0, 0]).astype(o_ref.dtype)


def _round_up(n, m):
    return ((n + m - 1) // m) * m


def _vmem_budget_and_cap():
    """(tile-sizing budget, scoped vmem_limit cap) per chip generation."""
    try:
        phys = int(pltpu.get_tpu_info().vmem_capacity_bytes)
    except Exception:  # pragma: no cover - query unavailable
        phys = 64 * _MIB                      # assume v7x-sized (conservative)
    if phys >= 100 * _MIB:                    # v5e / v6e: 128 MiB physical
        return 56 * _MIB, 64 * _MIB
    # v7x: 64 MiB per TC -> conservative tile budget, leave Mosaic headroom.
    return 26 * _MIB, max(phys - 8 * _MIB, 16 * _MIB)


def _choose_tile_b(batch, d, d1, d2, x_itemsize, w_itemsize, budget):
    """Largest batch tile whose working set (including resident weights) fits
    the budget.  Weights are budgeted double-buffered (worst case); Buffered(1)
    on the weight specs just adds headroom on top."""
    weight_bytes = 2 * ((d * d1 + d1 * d2 + d2) * w_itemsize
                        + (d1 + d2 + 1) * 4)
    avail = budget - weight_bytes
    min_t = 8 * max(1, 4 // max(x_itemsize, 1))   # sublane packing: 8/16/32
    # Megacore: keep >= 2 batch tiles when the batch is big enough so the
    # "parallel" grid axis spans both v7x TensorCores.
    if batch >= 4 * min_t:
        upper = _round_up(pl.cdiv(batch, 2), min_t)
    else:
        upper = max(batch, min_t)
    for t in (2048, 1024, 512, 256, 128, 64, 32, 16, 8):
        if t < min_t or t > upper:
            continue
        per_tile = (2 * t * d * x_itemsize        # double-buffered x tile
                    + 2 * t * 4                   # double-buffered out tile
                    + 2 * t * (d1 + d2) * 4)      # f32 intermediates headroom
        if per_tile <= avail:
            return t
    return min_t


def _vmem_limit_bytes(tile_b, d, d1, d2, x_itemsize, w_itemsize, cap):
    weights = 2 * ((d * d1 + d1 * d2 + d2) * w_itemsize + (d1 + d2 + 1) * 4)
    tiles = 2 * tile_b * (d * x_itemsize + 4) + 2 * tile_b * (d1 + d2) * 4
    est = weights + tiles
    return int(min(max(2 * est, 16 * _MIB), cap))


def lr_forward(x, params, *, compute_dtype=jnp.float32, tile_b=None):
    """x: [B, D] (any float dtype; streamed as-is, cast in-kernel).
    params: weights stored as [in, out] (w3 as a [d2, 1] column), f32 biases.
    Returns [B] float32 (matches PyTorch's .squeeze(dim=1))."""
    B, D = x.shape
    w1 = params["w1"].astype(compute_dtype)
    w2 = params["w2"].astype(compute_dtype)
    w3 = params["w3"].astype(compute_dtype)            # [d2, 1] column
    b1 = params["b1"].astype(jnp.float32)              # [1, d1]
    b2 = params["b2"].astype(jnp.float32)              # [1, d2]
    b3 = params["b3"].astype(jnp.float32)              # [1, 1]  (SMEM scalar)
    d1, d2 = w1.shape[1], w2.shape[1]

    x_item = jnp.dtype(x.dtype).itemsize
    w_item = jnp.dtype(compute_dtype).itemsize
    budget, cap = _vmem_budget_and_cap()
    if tile_b is None:
        tile_b = _choose_tile_b(B, D, d1, d2, x_item, w_item, budget)
    num_tiles = pl.cdiv(B, tile_b)     # partial last tile handled by Pallas;
                                       # garbage rows land in discarded output
    vmem_limit = _vmem_limit_bytes(tile_b, D, d1, d2, x_item, w_item, cap)

    def build(single_buffer_weights):
        def wspec(shape):
            idx = lambda i, _n=len(shape): (0,) * _n
            if single_buffer_weights:
                return pl.BlockSpec(shape, idx, pipeline_mode=pl.Buffered(1))
            return pl.BlockSpec(shape, idx)

        return pl.pallas_call(
            lr_mlp_kernel,
            out_shape=jax.ShapeDtypeStruct((B, 1), jnp.float32),
            grid=(num_tiles,),
            in_specs=[
                pl.BlockSpec((tile_b, D), lambda i: (i, 0)),   # x: streamed
                wspec((D, d1)),                                # w1: resident
                wspec((1, d1)),                                # b1: resident
                wspec((d1, d2)),                               # w2: resident
                wspec((1, d2)),                                # b2: resident
                wspec((d2, 1)),                                # w3: resident
                pl.BlockSpec(memory_space=pltpu.MemorySpace.SMEM),  # b3
            ],
            out_specs=pl.BlockSpec((tile_b, 1), lambda i: (i, 0)),
            compiler_params=pltpu.CompilerParams(
                dimension_semantics=("parallel",),
                vmem_limit_bytes=vmem_limit,
            ),
        )

    args = (x, w1, b1, w2, b2, w3, b3)
    try:
        if not hasattr(pl, "Buffered"):
            raise AttributeError("pl.Buffered unavailable")
        out = build(True)(*args)
    except Exception:
        # Fall back to default (double-buffered) specs; VMEM budget already
        # accounts for this worst case.
        out = build(False)(*args)
    return out[:, 0]


def init_params(key, dim):
    """PyTorch-Linear-style uniform init. Weights stored as [in, out]
    (pre-transposed for x @ W); w3 stored as a [dim//4, 1] column; biases f32."""
    d1, d2 = dim // 2, dim // 4
    keys = jax.random.split(key, 6)

    def uinit(k, shape, fan_in):
        bound = 1.0 / jnp.sqrt(fan_in)
        return jax.random.uniform(k, shape, jnp.float32, -bound, bound)

    return {
        "w1": uinit(keys[0], (dim, d1), dim),
        "b1": uinit(keys[1], (1, d1), dim),
        "w2": uinit(keys[2], (d1, d2), d1),
        "b2": uinit(keys[3], (1, d2), d1),
        "w3": uinit(keys[4], (d2, 1), d2),
        "b3": uinit(keys[5], (1, 1), d2),
    }


if __name__ == "__main__":
    key = jax.random.PRNGKey(0)
    B, dim = 8, 32
    k_x, k_p = jax.random.split(key)
    x = jax.random.normal(k_x, (B, dim), jnp.float32)
    params = init_params(k_p, dim)

    def reference(xx, p):
        h1 = jnp.maximum(xx @ p["w1"] + p["b1"], 0.0)
        h2 = jnp.maximum(h1 @ p["w2"] + p["b2"], 0.0)
        return (h2 @ p["w3"] + p["b3"])[:, 0]

    # f32 path
    y = lr_forward(x, params, compute_dtype=jnp.float32)
    jax.block_until_ready(y)
    assert y.shape == (B,), y.shape
    y_ref = reference(x, params)
    assert jnp.allclose(y, y_ref, atol=1e-5, rtol=1e-5), (y, y_ref)

    # bf16 weight path (f32 x streamed, cast in-kernel; f32 MXU accumulation)
    y_bf16 = lr_forward(x, params, compute_dtype=jnp.bfloat16)
    jax.block_until_ready(y_bf16)
    assert y_bf16.shape == (B,)
    assert jnp.allclose(y_bf16, y_ref, atol=1.5e-1, rtol=1.5e-1), (y_bf16, y_ref)

    # ragged batch (B not a multiple of the tile) exercises the partial-block path
    B2 = 13
    x2 = jax.random.normal(jax.random.PRNGKey(1), (B2, dim), jnp.float32)
    y2 = lr_forward(x2, params, compute_dtype=jnp.float32)
    jax.block_until_ready(y2)
    assert y2.shape == (B2,)
    assert jnp.allclose(y2, reference(x2, params), atol=1e-5, rtol=1e-5)

    print("KERNEL_OK")
</pallas_src>

<mosaic_0001>
module attributes {stable_mosaic.version = 11 : i64} {
  func.func @lr_mlp_kernel(%arg0: i32, %arg1: memref<8x32xf32, #tpu.memory_space<vmem>>, %arg2: memref<32x16xf32, #tpu.memory_space<vmem>>, %arg3: memref<1x16xf32, #tpu.memory_space<vmem>>, %arg4: memref<16x8xf32, #tpu.memory_space<vmem>>, %arg5: memref<1x8xf32, #tpu.memory_space<vmem>>, %arg6: memref<8x1xf32, #tpu.memory_space<vmem>>, %arg7: memref<1x1xf32, #tpu.memory_space<smem>>, %arg8: memref<8x1xf32, #tpu.memory_space<vmem>>) attributes {dimension_semantics = [#tpu.dimension_semantics<parallel>], iteration_bounds = array<i64: 1>, scalar_prefetch = 0 : i64, scratch_operands = 0 : i64, tpu.core_type = #tpu.core_type<tc>, window_params = [{transform_indices = @transform_0, window_bounds = array<i64: 8, 32>}, {pipeline_mode = #tpu.pipeline_mode<synchronous>, transform_indices = @transform_1, window_bounds = array<i64: 32, 16>}, {pipeline_mode = #tpu.pipeline_mode<synchronous>, transform_indices = @transform_2, window_bounds = array<i64: 1, 16>}, {pipeline_mode = #tpu.pipeline_mode<synchronous>, transform_indices = @transform_3, window_bounds = array<i64: 16, 8>}, {pipeline_mode = #tpu.pipeline_mode<synchronous>, transform_indices = @transform_4, window_bounds = array<i64: 1, 8>}, {pipeline_mode = #tpu.pipeline_mode<synchronous>, transform_indices = @transform_5, window_bounds = array<i64: 8, 1>}, {transform_indices = @transform_6, window_bounds = array<i64: 1, 1>}, {transform_indices = @transform_7, window_bounds = array<i64: 8, 1>}]} {
    %c0 = arith.constant 0 : index
    %c0_0 = arith.constant 0 : index
    %0 = vector.load %arg1[%c0, %c0_0] : memref<8x32xf32, #tpu.memory_space<vmem>>, vector<8x32xf32>
    %c0_1 = arith.constant 0 : index
    %c0_2 = arith.constant 0 : index
    %1 = vector.load %arg2[%c0_1, %c0_2] : memref<32x16xf32, #tpu.memory_space<vmem>>, vector<32x16xf32>
    %cst = arith.constant dense<0.000000e+00> : vector<8x16xf32>
    %2 = tpu.matmul %0, %1, %cst {dimension_numbers = #tpu.dot_dimension_numbers<[1], [0], [0], [1], [0, 0, 1, 1], [], []>} : vector<8x32xf32>, vector<32x16xf32>, vector<8x16xf32> -> vector<8x16xf32>
    %c0_3 = arith.constant 0 : index
    %c0_4 = arith.constant 0 : index
    %3 = vector.load %arg3[%c0_3, %c0_4] : memref<1x16xf32, #tpu.memory_space<vmem>>, vector<1x16xf32>
    %4 = vector.broadcast %3 : vector<1x16xf32> to vector<8x16xf32>
    %5 = arith.addf %2, %4 : vector<8x16xf32>
    %cst_5 = arith.constant 0.000000e+00 : f32
    %6 = vector.broadcast %cst_5 : f32 to vector<8x16xf32>
    %7 = arith.maximumf %5, %6 : vector<8x16xf32>
    %c0_6 = arith.constant 0 : index
    %c0_7 = arith.constant 0 : index
    %8 = vector.load %arg4[%c0_6, %c0_7] : memref<16x8xf32, #tpu.memory_space<vmem>>, vector<16x8xf32>
    %cst_8 = arith.constant dense<0.000000e+00> : vector<8x8xf32>
    %9 = tpu.matmul %7, %8, %cst_8 {dimension_numbers = #tpu.dot_dimension_numbers<[1], [0], [0], [1], [0, 0, 1, 1], [], []>} : vector<8x16xf32>, vector<16x8xf32>, vector<8x8xf32> -> vector<8x8xf32>
    %c0_9 = arith.constant 0 : index
    %c0_10 = arith.constant 0 : index
    %10 = vector.load %arg5[%c0_9, %c0_10] : memref<1x8xf32, #tpu.memory_space<vmem>>, vector<1x8xf32>
    %11 = vector.broadcast %10 : vector<1x8xf32> to vector<8x8xf32>
    %12 = arith.addf %9, %11 : vector<8x8xf32>
    %cst_11 = arith.constant 0.000000e+00 : f32
    %13 = vector.broadcast %cst_11 : f32 to vector<8x8xf32>
    %14 = arith.maximumf %12, %13 : vector<8x8xf32>
    %c0_12 = arith.constant 0 : index
    %c0_13 = arith.constant 0 : index
    %15 = vector.load %arg6[%c0_12, %c0_13] : memref<8x1xf32, #tpu.memory_space<vmem>>, vector<8x1xf32>
    %cst_14 = arith.constant dense<0.000000e+00> : vector<8x1xf32>
    %16 = tpu.matmul %14, %15, %cst_14 {dimension_numbers = #tpu.dot_dimension_numbers<[1], [0], [0], [1], [0, 0, 1, 1], [], []>} : vector<8x8xf32>, vector<8x1xf32>, vector<8x1xf32> -> vector<8x1xf32>
    %c0_15 = arith.constant 0 : index
    %c0_16 = arith.constant 0 : index
    %17 = memref.load %arg7[%c0_15, %c0_16] : memref<1x1xf32, #tpu.memory_space<smem>>
    %18 = vector.broadcast %17 : f32 to vector<8x1xf32>
    %19 = arith.addf %16, %18 : vector<8x1xf32>
    %c0_17 = arith.constant 0 : index
    %c0_18 = arith.constant 0 : index
    %20 = vector.load %arg8[%c0_17, %c0_18] : memref<8x1xf32, #tpu.memory_space<vmem>>, vector<8x1xf32>
    tpu.vector_store %arg8[%c0_17, %c0_18], %19 {strides = array<i32>} : memref<8x1xf32, #tpu.memory_space<vmem>>, vector<8x1xf32>,
    return
  }
  func.func @transform_0(%arg0: i32) -> (i32, i32) {
    %c0_i32 = arith.constant 0 : i32
    %c0_i32_0 = arith.constant 0 : i32
    return %arg0, %c0_i32 : i32, i32
  }
  func.func @transform_1(%arg0: i32) -> (i32, i32) {
    %c0_i32 = arith.constant 0 : i32
    %c0_i32_0 = arith.constant 0 : i32
    %c0_i32_1 = arith.constant 0 : i32
    return %c0_i32, %c0_i32_0 : i32, i32
  }
  func.func @transform_2(%arg0: i32) -> (i32, i32) {
    %c0_i32 = arith.constant 0 : i32
    %c0_i32_0 = arith.constant 0 : i32
    %c0_i32_1 = arith.constant 0 : i32
    return %c0_i32, %c0_i32_0 : i32, i32
  }
  func.func @transform_3(%arg0: i32) -> (i32, i32) {
    %c0_i32 = arith.constant 0 : i32
    %c0_i32_0 = arith.constant 0 : i32
    %c0_i32_1 = arith.constant 0 : i32
    return %c0_i32, %c0_i32_0 : i32, i32
  }
  func.func @transform_4(%arg0: i32) -> (i32, i32) {
    %c0_i32 = arith.constant 0 : i32
    %c0_i32_0 = arith.constant 0 : i32
    %c0_i32_1 = arith.constant 0 : i32
    return %c0_i32, %c0_i32_0 : i32, i32
  }
  func.func @transform_5(%arg0: i32) -> (i32, i32) {
    %c0_i32 = arith.constant 0 : i32
    %c0_i32_0 = arith.constant 0 : i32
    %c0_i32_1 = arith.constant 0 : i32
    return %c0_i32, %c0_i32_0 : i32, i32
  }
  func.func @transform_6(%arg0: i32) -> (i32, i32) {
    %c0_i32 = arith.constant 0 : i32
    %c0_i32_0 = arith.constant 0 : i32
    %c0_i32_1 = arith.constant 0 : i32
    return %c0_i32, %c0_i32_0 : i32, i32
  }
  func.func @transform_7(%arg0: i32) -> (i32, i32) {
    %c0_i32 = arith.constant 0 : i32
    %c0_i32_0 = arith.constant 0 : i32
    return %arg0, %c0_i32 : i32, i32
  }
}

module attributes {stable_mosaic.version = 11 : i64} {
  func.func @lr_mlp_kernel(%arg0: i32, %arg1: memref<8x32xf32, #tpu.memory_space<vmem>>, %arg2: memref<32x16xf32, #tpu.memory_space<vmem>>, %arg3: memref<1x16xf32, #tpu.memory_space<vmem>>, %arg4: memref<16x8xf32, #tpu.memory_space<vmem>>, %arg5: memref<1x8xf32, #tpu.memory_space<vmem>>, %arg6: memref<8x1xf32, #tpu.memory_space<vmem>>, %arg7: memref<1x1xf32, #tpu.memory_space<smem>>, %arg8: memref<8x1xf32, #tpu.memory_space<vmem>>) attributes {dimension_semantics = [#tpu.dimension_semantics<parallel>], iteration_bounds = array<i64: 1>, scalar_prefetch = 0 : i64, scratch_operands = 0 : i64, tpu.core_type = #tpu.core_type<tc>, window_params = [{transform_indices = @transform_0, window_bounds = array<i64: 8, 32>}, {pipeline_mode = #tpu.pipeline_mode<synchronous>, transform_indices = @transform_1, window_bounds = array<i64: 32, 16>}, {pipeline_mode = #tpu.pipeline_mode<synchronous>, transform_indices = @transform_2, window_bounds = array<i64: 1, 16>}, {pipeline_mode = #tpu.pipeline_mode<synchronous>, transform_indices = @transform_3, window_bounds = array<i64: 16, 8>}, {pipeline_mode = #tpu.pipeline_mode<synchronous>, transform_indices = @transform_4, window_bounds = array<i64: 1, 8>}, {pipeline_mode = #tpu.pipeline_mode<synchronous>, transform_indices = @transform_5, window_bounds = array<i64: 8, 1>}, {transform_indices = @transform_6, window_bounds = array<i64: 1, 1>}, {transform_indices = @transform_7, window_bounds = array<i64: 8, 1>}]} {
    %c0 = arith.constant 0 : index
    %c0_0 = arith.constant 0 : index
    %0 = vector.load %arg1[%c0, %c0_0] : memref<8x32xf32, #tpu.memory_space<vmem>>, vector<8x32xf32>
    %c0_1 = arith.constant 0 : index
    %c0_2 = arith.constant 0 : index
    %1 = vector.load %arg2[%c0_1, %c0_2] : memref<32x16xf32, #tpu.memory_space<vmem>>, vector<32x16xf32>
    %cst = arith.constant dense<0.000000e+00> : vector<8x16xf32>
    %2 = tpu.matmul %0, %1, %cst {dimension_numbers = #tpu.dot_dimension_numbers<[1], [0], [0], [1], [0, 0, 1, 1], [], []>} : vector<8x32xf32>, vector<32x16xf32>, vector<8x16xf32> -> vector<8x16xf32>
    %c0_3 = arith.constant 0 : index
    %c0_4 = arith.constant 0 : index
    %3 = vector.load %arg3[%c0_3, %c0_4] : memref<1x16xf32, #tpu.memory_space<vmem>>, vector<1x16xf32>
    %4 = vector.broadcast %3 : vector<1x16xf32> to vector<8x16xf32>
    %5 = arith.addf %2, %4 : vector<8x16xf32>
    %cst_5 = arith.constant 0.000000e+00 : f32
    %6 = vector.broadcast %cst_5 : f32 to vector<8x16xf32>
    %7 = arith.maximumf %5, %6 : vector<8x16xf32>
    %c0_6 = arith.constant 0 : index
    %c0_7 = arith.constant 0 : index
    %8 = vector.load %arg4[%c0_6, %c0_7] : memref<16x8xf32, #tpu.memory_space<vmem>>, vector<16x8xf32>
    %cst_8 = arith.constant dense<0.000000e+00> : vector<8x8xf32>
    %9 = tpu.matmul %7, %8, %cst_8 {dimension_numbers = #tpu.dot_dimension_numbers<[1], [0], [0], [1], [0, 0, 1, 1], [], []>} : vector<8x16xf32>, vector<16x8xf32>, vector<8x8xf32> -> vector<8x8xf32>
    %c0_9 = arith.constant 0 : index
    %c0_10 = arith.constant 0 : index
    %10 = vector.load %arg5[%c0_9, %c0_10] : memref<1x8xf32, #tpu.memory_space<vmem>>, vector<1x8xf32>
    %11 = vector.broadcast %10 : vector<1x8xf32> to vector<8x8xf32>
    %12 = arith.addf %9, %11 : vector<8x8xf32>
    %cst_11 = arith.constant 0.000000e+00 : f32
    %13 = vector.broadcast %cst_11 : f32 to vector<8x8xf32>
    %14 = arith.maximumf %12, %13 : vector<8x8xf32>
    %c0_12 = arith.constant 0 : index
    %c0_13 = arith.constant 0 : index
    %15 = vector.load %arg6[%c0_12, %c0_13] : memref<8x1xf32, #tpu.memory_space<vmem>>, vector<8x1xf32>
    %cst_14 = arith.constant dense<0.000000e+00> : vector<8x1xf32>
    %16 = tpu.matmul %14, %15, %cst_14 {dimension_numbers = #tpu.dot_dimension_numbers<[1], [0], [0], [1], [0, 0, 1, 1], [], []>} : vector<8x8xf32>, vector<8x1xf32>, vector<8x1xf32> -> vector<8x1xf32>
    %c0_15 = arith.constant 0 : index
    %c0_16 = arith.constant 0 : index
    %17 = memref.load %arg7[%c0_15, %c0_16] : memref<1x1xf32, #tpu.memory_space<smem>>
    %18 = vector.broadcast %17 : f32 to vector<8x1xf32>
    %19 = arith.addf %16, %18 : vector<8x1xf32>
    %c0_17 = arith.constant 0 : index
    %c0_18 = arith.constant 0 : index
    %20 = vector.load %arg8[%c0_17, %c0_18] : memref<8x1xf32, #tpu.memory_space<vmem>>, vector<8x1xf32>
    tpu.vector_store %arg8[%c0_17, %c0_18], %19 {strides = array<i32>} : memref<8x1xf32, #tpu.memory_space<vmem>>, vector<8x1xf32>,
    return
  }
  func.func @transform_0(%arg0: i32) -> (i32, i32) {
    %c0_i32 = arith.constant 0 : i32
    %c0_i32_0 = arith.constant 0 : i32
    return %arg0, %c0_i32 : i32, i32
  }
  func.func @transform_1(%arg0: i32) -> (i32, i32) {
    %c0_i32 = arith.constant 0 : i32
    %c0_i32_0 = arith.constant 0 : i32
    %c0_i32_1 = arith.constant 0 : i32
    return %c0_i32, %c0_i32_0 : i32, i32
  }
  func.func @transform_2(%arg0: i32) -> (i32, i32) {
    %c0_i32 = arith.constant 0 : i32
    %c0_i32_0 = arith.constant 0 : i32
    %c0_i32_1 = arith.constant 0 : i32
    return %c0_i32, %c0_i32_0 : i32, i32
  }
  func.func @transform_3(%arg0: i32) -> (i32, i32) {
    %c0_i32 = arith.constant 0 : i32
    %c0_i32_0 = arith.constant 0 : i32
    %c0_i32_1 = arith.constant 0 : i32
    return %c0_i32, %c0_i32_0 : i32, i32
  }
  func.func @transform_4(%arg0: i32) -> (i32, i32) {
    %c0_i32 = arith.constant 0 : i32
    %c0_i32_0 = arith.constant 0 : i32
    %c0_i32_1 = arith.constant 0 : i32
    return %c0_i32, %c0_i32_0 : i32, i32
  }
  func.func @transform_5(%arg0: i32) -> (i32, i32) {
    %c0_i32 = arith.constant 0 : i32
    %c0_i32_0 = arith.constant 0 : i32
    %c0_i32_1 = arith.constant 0 : i32
    return %c0_i32, %c0_i32_0 : i32, i32
  }
  func.func @transform_6(%arg0: i32) -> (i32, i32) {
    %c0_i32 = arith.constant 0 : i32
    %c0_i32_0 = arith.constant 0 : i32
    %c0_i32_1 = arith.constant 0 : i32
    return %c0_i32, %c0_i32_0 : i32, i32
  }
  func.func @transform_7(%arg0: i32) -> (i32, i32) {
    %c0_i32 = arith.constant 0 : i32
    %c0_i32_0 = arith.constant 0 : i32
    return %arg0, %c0_i32 : i32, i32
  }
}

</mosaic_0001>

<bundles_post_ra>
// kernel: tpu_custom_call.1
= control target key start
LH: loop header
LB: loop body
LE: loop exit
PB: predicated region body
PF: predicated region fallthrough
CT: control target
= control target key end

     0   :  { %v321_v0 = vmov 0.0   ;;  %vm322_vm0 = vmmov 0   ;;  %vm39_vm1 = vcmask 261120   ;;  %vm123_vm2 = vcmask 130048   ;;  %s402_s1 = inlined_call_operand.vmem [shape: f32[32,16], index: 1, kind: input, shape index: {}]   ;;  %s403_s0 = inlined_call_operand.vmem [shape: f32[8,32], index: 0, kind: input, shape index: {}]   ;;  %s404_s3 = inlined_call_operand.vmem [shape: f32[16,8], index: 3, kind: input, shape index: {}]   ;;  %s405_s2 = inlined_call_operand.vmem [shape: f32[1,16], index: 2, kind: input, shape index: {}]   ;;  %s406_s5 = inlined_call_operand.vmem [shape: f32[8,1], index: 5, kind: input, shape index: {}]   ;;  %s407_s4 = inlined_call_operand.vmem [shape: f32[1,8], index: 4, kind: input, shape index: {}]   ;;  %s408_s6 = inlined_call_operand.<no memory space> [shape: f32[1,1], index: 6, kind: input, shape index: {}]   ;;  %s409_s7 = inlined_call_operand.vmem [shape: f32[8,1], index: 7, kind: output, shape index: {}]  }
   0x1   :  { %296 = vmatprep.subr.mxu0 %v321_v0  ;;  %v31_v1 = vld [vmem:[%s402_s1 + $0x18] sm:$0xff]  ;;  %v30_v2 = vld [vmem:[%s402_s1 + $0x10] sm:$0xff]  ;;  %304 = vmatprep.mubr.msk.f32.mxu0 %vm322_vm0, %v321_v0  ;;  %v29_v3 = vld [vmem:[%s402_s1 + $0x8] sm:$0xff]  ;;  %vm201_vm3 = vcmask 64512   ;;  %v200_v19 = vstv %s408_s6  ;;  %vm275_vm4 = vcmask 7168  }
   0x2   :  { %297 = vmatpush3.msra.mxu0 %v31_v1  ;;  %307 = vmatprep.subr.mxu1 %v321_v0  ;;  %v28_v4 = vld [vmem:[%s402_s1] sm:$0xff]  ;;  %v115_v6 = vld [vmem:[%s404_s3 + $0x8] sm:$0xff] }
   0x3   :  { %298 = vmatprep.subr.mxu0 %v321_v0  ;;  %311 = vmatprep.mubr.msk.f32.mxu1 %vm322_vm0, %v321_v0  ;;  %v27_v5 = vld [vmem:[%s403_s0] sm:$0xff] }
   0x4   :  { %299 = vmatpush3.msra.mxu0 %v30_v2  ;;  %308 = vmatpush3.msra.mxu1 %v115_v6  ;;  %v114_v7 = vld [vmem:[%s404_s3] sm:$0xff] }
   0x5   :  { %300 = vmatprep.subr.mxu0 %v321_v0  ;;  %309 = vmatprep.subr.mxu1 %v321_v0  ;;  %v281_v8 = vld [vmem:[%s405_s2] ss:$0 sm:$0xff] }
   0x6   :  { %301 = vmatpush3.msra.mxu0 %v29_v3  ;;  %310 = vmatpush3.msra.mxu1 %v114_v7  ;;  %v198_v13 = vld [vmem:[%s406_s5] sm:$0xff] }
   0x7   :  { %302 = vmatprep.subr.mxu0 %v321_v0  ;;  %314 = vmatprep.subr.mxu1 %v321_v0  ;;  %v283_v14 = vld [vmem:[%s407_s4] ss:$0 sm:$0xff] }
   0x8   :  { %303 = vmatpush3.msra.mxu0 %v28_v4 }
   0x9   :  { %305 = vmatmul.mubr.msk.f32.vlgmr.msra.gmra.mxu0 %vm39_vm1, %v27_v5 }
  0xc9   :  { %v109_v9 = vpop.f32.mrf.mxu0 }
  0xca   :  { %v110_v10 = vadd.f32 %v281_v8, %v109_v9 }
  0xcb   :  { %v306_v11 = vpop.f32.mrf.mxu0 }
  0xcc   :  { %v113_v12 = vmax.f32 %v110_v10, 0.0 }
  0xce   :  { %312 = vmatmul.mubr.msk.f32.vlgmr.msra.gmra.mxu1 %vm123_vm2, %v113_v12 }
  0xcf   :  { %316 = vmatprep.mubr.msk.f32.mxu1 %vm322_vm0, %v321_v0  ;;  %315 = vmatpush3.msra.mxu1 %v198_v13 }
 0x18e   :  { %v193_v15 = vpop.f32.mrf.mxu1 }
 0x18f   :  { %v194_v16 = vadd.f32 %v283_v14, %v193_v15 }
 0x190   :  { %v313_v17 = vpop.f32.mrf.mxu1 }
 0x191   :  { %v197_v18 = vmax.f32 %v194_v16, 0.0 }
 0x193   :  { %317 = vmatmul.mubr.msk.f32.vlgmr.msra.gmra.mxu1 %vm201_vm3, %v197_v18 }
 0x253   :  { %v271_v20 = vpop.f32.mrf.mxu1 }
 0x254   :  { %v272_v21 = vadd.f32 %v271_v20, %v200_v19 }
 0x255   :  { %v318_v22 = vpop.f32.mrf.mxu1 }
 0x256   :  { %276 = vst.msk [vmem:[%s409_s7] sm:$0xff] %vm275_vm4, %v272_v21 }

// kernel: tpu_custom_call.1
= control target key start
LH: loop header
LB: loop body
LE: loop exit
PB: predicated region body
PF: predicated region fallthrough
CT: control target
= control target key end

     0   :  { %v321_v0 = vmov 0.0   ;;  %vm322_vm0 = vmmov 0   ;;  %vm39_vm1 = vcmask 261120   ;;  %vm123_vm2 = vcmask 130048   ;;  %s402_s1 = inlined_call_operand.vmem [shape: f32[32,16], index: 1, kind: input, shape index: {}]   ;;  %s403_s0 = inlined_call_operand.vmem [shape: f32[8,32], index: 0, kind: input, shape index: {}]   ;;  %s404_s3 = inlined_call_operand.vmem [shape: f32[16,8], index: 3, kind: input, shape index: {}]   ;;  %s405_s2 = inlined_call_operand.vmem [shape: f32[1,16], index: 2, kind: input, shape index: {}]   ;;  %s406_s5 = inlined_call_operand.vmem [shape: f32[8,1], index: 5, kind: input, shape index: {}]   ;;  %s407_s4 = inlined_call_operand.vmem [shape: f32[1,8], index: 4, kind: input, shape index: {}]   ;;  %s408_s6 = inlined_call_operand.<no memory space> [shape: f32[1,1], index: 6, kind: input, shape index: {}]   ;;  %s409_s7 = inlined_call_operand.vmem [shape: f32[8,1], index: 7, kind: output, shape index: {}]  }
   0x1   :  { %296 = vmatprep.subr.mxu0 %v321_v0  ;;  %v31_v1 = vld [vmem:[%s402_s1 + $0x18] sm:$0xff]  ;;  %v30_v2 = vld [vmem:[%s402_s1 + $0x10] sm:$0xff]  ;;  %304 = vmatprep.mubr.msk.f32.mxu0 %vm322_vm0, %v321_v0  ;;  %v29_v3 = vld [vmem:[%s402_s1 + $0x8] sm:$0xff]  ;;  %vm201_vm3 = vcmask 64512   ;;  %v200_v19 = vstv %s408_s6  ;;  %vm275_vm4 = vcmask 7168  }
   0x2   :  { %297 = vmatpush3.msra.mxu0 %v31_v1  ;;  %307 = vmatprep.subr.mxu1 %v321_v0  ;;  %v28_v4 = vld [vmem:[%s402_s1] sm:$0xff]  ;;  %v115_v6 = vld [vmem:[%s404_s3 + $0x8] sm:$0xff] }
   0x3   :  { %298 = vmatprep.subr.mxu0 %v321_v0  ;;  %311 = vmatprep.mubr.msk.f32.mxu1 %vm322_vm0, %v321_v0  ;;  %v27_v5 = vld [vmem:[%s403_s0] sm:$0xff] }
   0x4   :  { %299 = vmatpush3.msra.mxu0 %v30_v2  ;;  %308 = vmatpush3.msra.mxu1 %v115_v6  ;;  %v114_v7 = vld [vmem:[%s404_s3] sm:$0xff] }
   0x5   :  { %300 = vmatprep.subr.mxu0 %v321_v0  ;;  %309 = vmatprep.subr.mxu1 %v321_v0  ;;  %v281_v8 = vld [vmem:[%s405_s2] ss:$0 sm:$0xff] }
   0x6   :  { %301 = vmatpush3.msra.mxu0 %v29_v3  ;;  %310 = vmatpush3.msra.mxu1 %v114_v7  ;;  %v198_v13 = vld [vmem:[%s406_s5] sm:$0xff] }
   0x7   :  { %302 = vmatprep.subr.mxu0 %v321_v0  ;;  %314 = vmatprep.subr.mxu1 %v321_v0  ;;  %v283_v14 = vld [vmem:[%s407_s4] ss:$0 sm:$0xff] }
   0x8   :  { %303 = vmatpush3.msra.mxu0 %v28_v4 }
   0x9   :  { %305 = vmatmul.mubr.msk.f32.vlgmr.msra.gmra.mxu0 %vm39_vm1, %v27_v5 }
  0xc9   :  { %v109_v9 = vpop.f32.mrf.mxu0 }
  0xca   :  { %v110_v10 = vadd.f32 %v281_v8, %v109_v9 }
  0xcb   :  { %v306_v11 = vpop.f32.mrf.mxu0 }
  0xcc   :  { %v113_v12 = vmax.f32 %v110_v10, 0.0 }
  0xce   :  { %312 = vmatmul.mubr.msk.f32.vlgmr.msra.gmra.mxu1 %vm123_vm2, %v113_v12 }
  0xcf   :  { %316 = vmatprep.mubr.msk.f32.mxu1 %vm322_vm0, %v321_v0  ;;  %315 = vmatpush3.msra.mxu1 %v198_v13 }
 0x18e   :  { %v193_v15 = vpop.f32.mrf.mxu1 }
 0x18f   :  { %v194_v16 = vadd.f32 %v283_v14, %v193_v15 }
 0x190   :  { %v313_v17 = vpop.f32.mrf.mxu1 }
 0x191   :  { %v197_v18 = vmax.f32 %v194_v16, 0.0 }
 0x193   :  { %317 = vmatmul.mubr.msk.f32.vlgmr.msra.gmra.mxu1 %vm201_vm3, %v197_v18 }
 0x253   :  { %v271_v20 = vpop.f32.mrf.mxu1 }
 0x254   :  { %v272_v21 = vadd.f32 %v271_v20, %v200_v19 }
 0x255   :  { %v318_v22 = vpop.f32.mrf.mxu1 }
 0x256   :  { %276 = vst.msk [vmem:[%s409_s7] sm:$0xff] %vm275_vm4, %v272_v21 }

</bundles_post_ra>
